<compile_context>
chip_gen: v6e
topology: v6e:2x2x1
jax: 0.10.0
libtpu: 0.0.40
codegen_flags: <defaults>
</compile_context>

<pallas_src>
import functools

import jax
import jax.numpy as jnp
from jax.experimental import pallas as pl
from jax.experimental.pallas import tpu as pltpu

EPS = 1e-6


def _gem_head_kernel(x_ref, m_ref, wt_ref, b_ref, out_ref, *, p, eps):
    """One batch tile of GeM pooling + linear head.

    x_ref  : [TB*HW, C]   feature rows for TB samples (C on lanes)
    m_ref  : [TB, TB*HW]  block-diagonal averaging matrix (entries 1/HW)
    wt_ref : [C, NC_pad]  linear weight, pre-transposed & zero-padded
    b_ref  : [1, NC_pad]  bias row, zero-padded
    out_ref: [TB, NC_pad]
    """
    x = x_ref[...].astype(jnp.float32)
    xc = jnp.maximum(x, eps)

    # x^p : VPU repeated-multiply for small integer p (default gem_p = 3),
    # EUP exp/log fallback for general p.
    p_int = int(round(p))
    if abs(p - p_int) < 1e-12 and 1 <= p_int <= 8:
        xp = xc
        for _ in range(p_int - 1):
            xp = xp * xc
    else:
        xp = jnp.exp(p * jnp.log(xc))

    # Spatial mean on the MXU: [TB, TB*HW] @ [TB*HW, C] -> [TB, C]
    pooled = jnp.dot(m_ref[...], xp, preferred_element_type=jnp.float32)

    # pooled^(1/p) — tiny [TB, C] tensor, EUP is fine here.
    if abs(p - 1.0) < 1e-12:
        gem = pooled
    else:
        gem = jnp.exp(jnp.log(pooled) * (1.0 / p))

    # Linear head (training path: mean of 5 dropout(p=0)+linear == one linear).
    logits = jnp.dot(gem, wt_ref[...], preferred_element_type=jnp.float32)
    logits = logits + b_ref[...]
    out_ref[...] = logits.astype(out_ref.dtype)


def _pick_batch_tile(B, bytes_per_sample, vmem_budget_bytes, max_batch_tile=None):
    # candidate tiles: divisors of B that are multiples of 8 (clean (8,128) blocks),
    # plus B itself (block == full dim is always legal).
    cands = [tb for tb in range(8, B + 1, 8) if B % tb == 0]
    if B not in cands:
        cands.append(B)
    if max_batch_tile is not None:
        limited = [tb for tb in cands if tb <= max_batch_tile]
        cands = limited or [min(cands)]
    # double-buffered feature block must fit the budget
    fitting = [tb for tb in cands if 2 * tb * bytes_per_sample <= vmem_budget_bytes]
    return max(fitting) if fitting else min(cands)


def custom_model_head(feat_nchw, p, weight, bias, *, eps=EPS,
                      max_batch_tile=None,
                      vmem_budget_bytes=16 * 1024 * 1024):
    """feat_nchw: [B, C, H, W] float32 encoder output (stand-in for EfficientNet-B0).
       p: GeM exponent (static Python float), weight: [NC, C], bias: [NC]."""
    B, C, H, W = feat_nchw.shape
    HW = H * W
    NC = weight.shape[0]
    NC_pad = ((NC + 127) // 128) * 128

    bytes_per_sample = HW * C * 4
    TB = _pick_batch_tile(B, bytes_per_sample, vmem_budget_bytes, max_batch_tile)

    # NCHW -> NHWC-flat: [B*HW, C], channels on the lane axis.
    x = jnp.transpose(feat_nchw, (0, 2, 3, 1)).reshape(B * HW, C).astype(jnp.float32)

    # Pre-transposed, lane-padded weight / bias (padded columns are zero; the
    # wrapper slices the first NC logits back out).
    wt = jnp.zeros((C, NC_pad), jnp.float32).at[:, :NC].set(weight.T.astype(jnp.float32))
    b_row = jnp.zeros((1, NC_pad), jnp.float32).at[:, :NC].set(
        bias.astype(jnp.float32)[None, :])

    # Block-diagonal averaging matrix for the MXU spatial reduction.
    m = jnp.kron(jnp.eye(TB, dtype=jnp.float32),
                 jnp.full((1, HW), 1.0 / HW, dtype=jnp.float32))

    kernel = functools.partial(_gem_head_kernel, p=float(p), eps=float(eps))

    out_padded = pl.pallas_call(
        kernel,
        out_shape=jax.ShapeDtypeStruct((B, NC_pad), jnp.float32),
        grid=(B // TB,),
        in_specs=[
            pl.BlockSpec((TB * HW, C), lambda i: (i, 0)),
            pl.BlockSpec((TB, TB * HW), lambda i: (0, 0)),
            pl.BlockSpec((C, NC_pad), lambda i: (0, 0)),
            pl.BlockSpec((1, NC_pad), lambda i: (0, 0)),
        ],
        out_specs=pl.BlockSpec((TB, NC_pad), lambda i: (i, 0)),
        compiler_params=pltpu.CompilerParams(
            dimension_semantics=("parallel",),
            vmem_limit_bytes=32 * 1024 * 1024,
        ),
    )(x, m, wt, b_row)

    return out_padded[:, :NC]


if __name__ == "__main__":
    # Small shapes consistent with the forward pass: C stands in for
    # classifier_in_features (1280 for EfficientNet-B0), num_classes=1, gem_p=3.
    B, C, H, W = 16, 128, 8, 8
    NUM_CLASSES = 1
    GEM_P = 3.0

    key = jax.random.PRNGKey(0)
    k_feat, k_w, k_b = jax.random.split(key, 3)

    feat = jax.random.normal(k_feat, (B, C, H, W), dtype=jnp.float32)
    bound = 1.0 / jnp.sqrt(C)
    weight = jax.random.uniform(k_w, (NUM_CLASSES, C), jnp.float32, -bound, bound)
    bias = jax.random.uniform(k_b, (NUM_CLASSES,), jnp.float32, -bound, bound)

    # max_batch_tile=8 -> grid=(2,), exercising the pipelined batch tiling.
    out = custom_model_head(feat, GEM_P, weight, bias, max_batch_tile=8)
    jax.block_until_ready(out)

    # pure-JAX reference of the same forward math
    xc = jnp.maximum(feat, EPS) ** GEM_P
    gem_ref = jnp.mean(xc.reshape(B, C, -1), axis=-1) ** (1.0 / GEM_P)
    ref = gem_ref @ weight.T + bias

    assert out.shape == ref.shape, (out.shape, ref.shape)
    assert jnp.allclose(out, ref, rtol=2e-3, atol=2e-3), (out, ref)

    print("KERNEL_OK")
</pallas_src>

<mosaic_0001>
module attributes {stable_mosaic.version = 11 : i64} {
  func.func @_gem_head_kernel(%arg0: i32, %arg1: memref<512x128xf32, #tpu.memory_space<vmem>>, %arg2: memref<8x512xf32, #tpu.memory_space<vmem>>, %arg3: memref<128x128xf32, #tpu.memory_space<vmem>>, %arg4: memref<1x128xf32, #tpu.memory_space<vmem>>, %arg5: memref<8x128xf32, #tpu.memory_space<vmem>>) attributes {dimension_semantics = [#tpu.dimension_semantics<parallel>], iteration_bounds = array<i64: 2>, scalar_prefetch = 0 : i64, scratch_operands = 0 : i64, tpu.core_type = #tpu.core_type<tc>, window_params = [{transform_indices = @transform_0, window_bounds = array<i64: 512, 128>}, {pipeline_mode = #tpu.pipeline_mode<synchronous>, transform_indices = @transform_1, window_bounds = array<i64: 8, 512>}, {pipeline_mode = #tpu.pipeline_mode<synchronous>, transform_indices = @transform_2, window_bounds = array<i64: 128, 128>}, {pipeline_mode = #tpu.pipeline_mode<synchronous>, transform_indices = @transform_3, window_bounds = array<i64: 1, 128>}, {transform_indices = @transform_4, window_bounds = array<i64: 8, 128>}]} {
    %c0 = arith.constant 0 : index
    %c0_0 = arith.constant 0 : index
    %0 = vector.load %arg1[%c0, %c0_0] : memref<512x128xf32, #tpu.memory_space<vmem>>, vector<512x128xf32>
    %cst = arith.constant 9.99999997E-7 : f32
    %1 = vector.broadcast %cst : f32 to vector<512x128xf32>
    %2 = arith.maximumf %0, %1 : vector<512x128xf32>
    %3 = arith.mulf %2, %2 : vector<512x128xf32>
    %4 = arith.mulf %3, %2 : vector<512x128xf32>
    %c0_1 = arith.constant 0 : index
    %c0_2 = arith.constant 0 : index
    %5 = vector.load %arg2[%c0_1, %c0_2] : memref<8x512xf32, #tpu.memory_space<vmem>>, vector<8x512xf32>
    %cst_3 = arith.constant dense<0.000000e+00> : vector<8x128xf32>
    %6 = tpu.matmul %5, %4, %cst_3 {dimension_numbers = #tpu.dot_dimension_numbers<[1], [0], [0], [1], [0, 0, 1, 1], [], []>} : vector<8x512xf32>, vector<512x128xf32>, vector<8x128xf32> -> vector<8x128xf32>
    %7 = math.log %6 : vector<8x128xf32>
    %cst_4 = arith.constant 0.333333343 : f32
    %8 = vector.broadcast %cst_4 : f32 to vector<8x128xf32>
    %9 = arith.mulf %7, %8 : vector<8x128xf32>
    %10 = math.exp %9 : vector<8x128xf32>
    %c0_5 = arith.constant 0 : index
    %c0_6 = arith.constant 0 : index
    %11 = vector.load %arg3[%c0_5, %c0_6] : memref<128x128xf32, #tpu.memory_space<vmem>>, vector<128x128xf32>
    %cst_7 = arith.constant dense<0.000000e+00> : vector<8x128xf32>
    %12 = tpu.matmul %10, %11, %cst_7 {dimension_numbers = #tpu.dot_dimension_numbers<[1], [0], [0], [1], [0, 0, 1, 1], [], []>} : vector<8x128xf32>, vector<128x128xf32>, vector<8x128xf32> -> vector<8x128xf32>
    %c0_8 = arith.constant 0 : index
    %c0_9 = arith.constant 0 : index
    %13 = vector.load %arg4[%c0_8, %c0_9] : memref<1x128xf32, #tpu.memory_space<vmem>>, vector<1x128xf32>
    %14 = vector.broadcast %13 : vector<1x128xf32> to vector<8x128xf32>
    %15 = arith.addf %12, %14 : vector<8x128xf32>
    %c0_10 = arith.constant 0 : index
    %c0_11 = arith.constant 0 : index
    %16 = vector.load %arg5[%c0_10, %c0_11] : memref<8x128xf32, #tpu.memory_space<vmem>>, vector<8x128xf32>
    tpu.vector_store %arg5[%c0_10, %c0_11], %15 {strides = array<i32>} : memref<8x128xf32, #tpu.memory_space<vmem>>, vector<8x128xf32>,
    return
  }
  func.func @transform_0(%arg0: i32) -> (i32, i32) {
    %c0_i32 = arith.constant 0 : i32
    %c0_i32_0 = arith.constant 0 : i32
    return %arg0, %c0_i32 : i32, i32
  }
  func.func @transform_1(%arg0: i32) -> (i32, i32) {
    %c0_i32 = arith.constant 0 : i32
    %c0_i32_0 = arith.constant 0 : i32
    %c0_i32_1 = arith.constant 0 : i32
    return %c0_i32, %c0_i32_0 : i32, i32
  }
  func.func @transform_2(%arg0: i32) -> (i32, i32) {
    %c0_i32 = arith.constant 0 : i32
    %c0_i32_0 = arith.constant 0 : i32
    %c0_i32_1 = arith.constant 0 : i32
    return %c0_i32, %c0_i32_0 : i32, i32
  }
  func.func @transform_3(%arg0: i32) -> (i32, i32) {
    %c0_i32 = arith.constant 0 : i32
    %c0_i32_0 = arith.constant 0 : i32
    %c0_i32_1 = arith.constant 0 : i32
    return %c0_i32, %c0_i32_0 : i32, i32
  }
  func.func @transform_4(%arg0: i32) -> (i32, i32) {
    %c0_i32 = arith.constant 0 : i32
    %c0_i32_0 = arith.constant 0 : i32
    return %arg0, %c0_i32 : i32, i32
  }
}

</mosaic_0001>

<bundles_post_ra>
// kernel: tpu_custom_call.1
= control target key start
LH: loop header
LB: loop body
LE: loop exit
PB: predicated region body
PF: predicated region fallthrough
CT: control target
= control target key end

     0   :  { %s1505_s0 = inlined_call_operand.hbm [shape: f32[1024,128], index: 0, kind: input, shape index: {}]   ;;  %s1506_s1 = inlined_call_operand.hbm [shape: f32[8,512], index: 1, kind: input, shape index: {}]   ;;  %s1507_s2 = inlined_call_operand.hbm [shape: f32[128,128], index: 2, kind: input, shape index: {}]   ;;  %s1508_s3 = inlined_call_operand.vmem [shape: f32[1,128], index: 3, kind: input, shape index: {}]   ;;  %s1509_s4 = inlined_call_operand.hbm [shape: f32[16,128], index: 4, kind: output, shape index: {}]  }
   0x1   :  { %1514 = sst [smem:[#allocation12_spill]] %s1506_s1 }
   0x2   :  { %9 = vsyncpa [#allocation3], 0 }
   0x3   :  { %11 = vsyncpa [#allocation3 + $0x1], 0 }
   0x4   :  { %12 = vsyncpa [#allocation6], 0 }
   0x5   :  { %13 = vsyncpa [#allocation4], 0 }
   0x6   :  { %15 = vsyncpa [#allocation4 + $0x1], 0  ;;  %s1245_s15 = smov 0   ;;  %s1247_s16 = smov 0  }
   0x7   :  { %s1249_s17 = smov 0   ;;  %s1251_s18 = smov 0  }
   0x8 LB: > { %s1266_s19 = sadd.s32 4294967295, %s1210_s18   ;;  %s846_s20 = sadd.s32 4294967294, %s1210_s18   ;;  %s1210_s18 = sphi %s1251_s18, %s1534_s18   ;;  %s1206_s17 = sphi %s1249_s17, %s1533_s17   ;;  %s1202_s16 = sphi %s1247_s16, %s1532_s16   ;;  %s1198_s15 = sphi %s1245_s15, %s1531_s15  }
   0x9   : > { %s1270_s21 = sadd.s32 1, %s1210_s18   ;;  %s28_s22 = sadd.s32 1, %s1206_s17 }
   0xa   : > { %s25_s23 = ssub.s32 %s1210_s18, %s1270_s21  ;;  %p35_p0 = scmp.ne.s32.totalorder %s1206_s17, %s1202_s16 }
   0xb   : > { %p26_p1 = scmp.eq.s32.totalorder %s25_s23, 0  ;;  %p36_p2 = scmp.eq.s32.totalorder %s1210_s18, 0 }
   0xc   : > { %p41_p3 = scmp.ne.s32.totalorder %s1202_s16, %s1198_s15  ;;  %p1510_p4 = scmp.eq.s32.totalorder %s1266_s19, 0 }
   0xd   : > { %s1282_s24 = scalar_select %p26_p1, %s1206_s17, %s28_s22  }
   0xe   : > { %p1284_p5 = por %p36_p2, %p35_p0  ;;  %p1290_p6 = por %p1510_p4, %p41_p3 }
   0xf   : > { %p128_p7 = scmp.eq.s32.totalorder %s1266_s19, 1  ;;  %p134_p8 = scmp.eq.s32.totalorder %s846_s20, 1 }
  0x10   : > { %s1516_s26 = scalar_select %p1290_p6, 1, 0 }
  0x11   : > { %p847_p9 = scmp.ge.s32.totalorder %s1210_s18, 1  ;;  %p141_p10 = scmp.lt.s32.totalorder %s1210_s18, 3 }
  0x12   : > { %p1297_p11 = por %p128_p7, %p35_p0  ;;  %p1301_p12 = por %p134_p8, %p41_p3 }
  0x13   : > { %p1305_p13 = pnand %p847_p9, %p141_p10  ;;  %s1212_s30 = smov [#allocation5]  }
  0x14   : > { %s1517_s27 = scalar_select %p1297_p11, 1, 0 }
  0x15   : > { %s1518_s28 = scalar_select %p1301_p12, 1, 0 }
  0x16   : > { %s1519_s29 = scalar_select %p1305_p13, 1, 0 }
  0x17   : > { %p999_p2 = pneg %p1305_p13  ;;  %s154_s5 = sshll.u32 %s1212_s30, 4  ;;  %s155_s5 = int_to_ptr.vmem [resolvable:$true] %s154_s5 }
  0x18   : > { %p1016_p4 = scmp.lt.s32.totalorder %s1210_s18, 2  ;;  %p1520_p0 = scmp.eq.s32.totalorder %s1266_s19, 0 }
  0x19   : > { %s1213_s8 = smov [#allocation7]   ;;  %s1073_s10 = scalar_lea.vmem %s155_s5, 512 }
  0x1a   : > { %p1315_p7 = pnand %p999_p2, %p1520_p0  ;;  %p1321_p3 = pnand %p1016_p4, %p1284_p5 }
  0x1b   : > { %s164_s9 = sshll.u32 %s1213_s8, 4  ;;  %p1074_p9 = scmp.ne.s32.totalorder %s155_s5, %s1073_s10  ;;  %s165_s9 = int_to_ptr.vmem [resolvable:$true] %s164_s9 }
  0x1c   : > { %p1064_p8 = pneg %p1315_p7  ;;  %p1081_p0 = scmp.lt.s32.totalorder %s155_s5, %s155_s5 }
  0x1d   : > { %p1082_p1 = scmp.lt.s32.totalorder %s1073_s10, %s1073_s10 }
  0x1e   : > { %p1076_p10 = pnand %p1074_p9, %p1064_p8 }
  0x1f   : > { %p1083_p12 = por %p1082_p1, %p1081_p0 }
  0x20   : > { %p1077_p2 = pneg %p1076_p10 }
  0x22   : > { %p1084_p11 = pnand %p1083_p12, %p1077_p2 }
  0x24   : > { %1087 = shalt.err (!%p1084_p11)
}
  0x25   : > { %s1523_s1 = sld [smem:[#allocation12_spill]]  ;;  %s181_s13 = sand.u32 1, %s1206_s17  }
  0x26   : > { %s1099_s14 = scalar_lea.vmem %s165_s9, 2048  ;;  %p1107_p10 = scmp.lt.s32.totalorder %s165_s9, %s165_s9 }
  0x27   : > { %p1100_p4 = scmp.ne.s32.totalorder %s165_s9, %s1099_s14  ;;  %p1108_p6 = scmp.lt.s32.totalorder %s1099_s14, %s1099_s14 }
  0x29   : > { %p1102_p5 = pnand %p1100_p4, %p1064_p8  ;;  %p1109_p1 = por %p1108_p6, %p1107_p10 }
  0x2b   : > { %1002 = dma.hbm_to_vmem [thread:$0]  (!%p1315_p7), %s1523_s1, 512, %s155_s5, [#allocation6]  }
  0x2c   : > { %p1103_p9 = pneg %p1102_p5 }
  0x2e   : > { %p1110_p12 = pnand %p1109_p1, %p1103_p9 }
  0x30   : > { %1113 = shalt.err (!%p1110_p12)
}
  0x31   : > { %s1214_s20 = smov 128   ;;  %s1215_s22 = smov 8  }
  0x32   : > { %1005 = dma.hbm_to_vmem [thread:$0]  (!%p1315_p7), %s1507_s2, 2048, %s165_s9, [#allocation6], %s1214_s20, %s1214_s20, %s1215_s22  }
  0x33   : > { %s851_s30 = sshll.u32 %s181_s13, 9  ;;  %s864_s5 = sshll.u32 %s1210_s18, 13 }
  0x34   : > { %s1351_s11 = scalar_lea.hbm %s1505_s0, %s864_s5  ;;  %s185_s12 = scalar_lea.vmem [#allocation2], %s851_s30 }
  0x35   : > { %s192_s14 = sshll.u32 %s185_s12, 4  ;;  %s1355_s6 = scalar_lea.sflag [#allocation3], %s181_s13  ;;  %s1353_s14 = int_to_ptr.vmem [resolvable:$true] %s192_s14 }
  0x36   : > { %s1114_s1 = scalar_lea.hbm %s1351_s11, 8192  ;;  %p1116_p11 = pneg %p1321_p3 }
  0x37   : > { %p1115_p6 = scmp.ne.s32.totalorder %s1351_s11, %s1114_s1  ;;  %s1119_s25 = scalar_lea.hbm %s1505_s0, 16384 }
  0x38   : > { %p1120_p2 = scmp.lt.s32.totalorder %s1351_s11, %s1505_s0  ;;  %p1121_p0 = scmp.lt.s32.totalorder %s1119_s25, %s1114_s1 }
  0x39   : > { %p1117_p7 = pnand %p1116_p11, %p1115_p6 }
  0x3a   : > { %p1122_p4 = por %p1121_p0, %p1120_p2 }
  0x3b   : > { %p1118_p8 = pneg %p1117_p7 }
  0x3d   : > { %p1123_p5 = pnand %p1122_p4, %p1118_p8 }
  0x3f   : > { %1126 = shalt.err (!%p1123_p5)
}
  0x40   : > { %s1127_s13 = scalar_lea.vmem %s1353_s14, 8192  ;;  %s1216_s30 = smov [#allocation2]  }
  0x41   : > { %p1128_p9 = scmp.ne.s32.totalorder %s1353_s14, %s1127_s13  ;;  %s1132_s10 = sshll.u32 %s1216_s30, 4  ;;  %s1133_s10 = int_to_ptr.vmem [resolvable:$false] %s1132_s10 }
  0x42   : > { %s1134_s12 = scalar_lea.vmem %s1133_s10, 16384  ;;  %p1135_p12 = scmp.lt.s32.totalorder %s1353_s14, %s1133_s10 }
  0x43   : > { %p1130_p10 = pnand %p1128_p9, %p1116_p11  ;;  %p1136_p6 = scmp.lt.s32.totalorder %s1134_s12, %s1127_s13 }
  0x45   : > { %p1131_p1 = pneg %p1130_p10  ;;  %p1137_p7 = por %p1136_p6, %p1135_p12 }
  0x47   : > { %p1138_p13 = pnand %p1137_p7, %p1131_p1 }
  0x49   : > { %1141 = shalt.err (!%p1138_p13)
}
  0x4a   : > { %1009 = dma.hbm_to_vmem [thread:$0]  (!%p1321_p3), %s1351_s11, 8192, %s1353_s14, %s1355_s6, %s1214_s20, %s1214_s20, %s1215_s22  }
  0x4b   : > { %p1524_p11 = scmp.ne.s32.totalorder %s1519_s29, 0 }
  0x4c   : > { %s1382_s1 = sand.u32 (!%p1524_p11), 1, %s1202_s16   ;;  %p1525_p13 = scmp.ne.s32.totalorder (!%p1524_p11), %s1516_s26, 0 }
  0x4d   : > { %204 = sbr.rel (%p1524_p11) target bundleno = 582 (0x246), region = 36  ;;  %s855_s9 = sshll.u32 (!%p1524_p11), %s1382_s1, 9 }
  0x4e   : > { %s207_s23 = scalar_lea.sflag (!%p1524_p11), [#allocation3], %s1382_s1  ;;  %s1386_s25 = scalar_lea.vmem (!%p1524_p11), [#allocation2], %s855_s9 }
  0x52   : > { %1185 = dma.done.wait (%p1525_p13), %s207_s23, 8192  }
  0x53   : > { %1187 = vsyncadd (%p1525_p13), %s207_s23, 4294959104  ;;  %p1526_p3 = scmp.eq.s32.totalorder %s1266_s19, 0 }
  0x55   : > { %1189 = dma.done.wait (%p1526_p3), [#allocation6], 2560   ;;  %p1527_p8 = pmov %p1526_p3 }
  0x56   : > { %v275_v0 = vld [vmem:[%s1386_s25 + $0xf8] sm:$0xff]  ;;  %v274_v7 = vld [vmem:[%s1386_s25 + $0xf0] sm:$0xff]  ;;  %v273_v15 = vld [vmem:[%s1386_s25 + $0xe8] sm:$0xff]  ;;  %vm1218_vm0 = vmmov 0   ;;  %s858_s26 = sshll.u32 %s1382_s1, 3  ;;  %s861_s20 = sshll.u32 %s1266_s19, 7 }
  0x57   : > { %1191 = vsyncadd (%p1527_p8), [#allocation6], 4294964736  ;;  %v307_v1 = vld [vmem:[%s1386_s25 + $0x1f8] sm:$0xff]  ;;  %v339_v3 = vmax.f32 %v275_v0, 1e-06  ;;  %v306_v8 = vld [vmem:[%s1386_s25 + $0x1f0] sm:$0xff]  ;;  %s1468_s5 = scalar_lea.hbm %s1509_s4, %s861_s20 }
  0x58   : > { %v259_v2 = vld [vmem:[%s1386_s25 + $0x78] sm:$0xff]  ;;  %v371_v4 = vmax.f32 %v307_v1, 1e-06  ;;  %v258_v13 = vld [vmem:[%s1386_s25 + $0x70] sm:$0xff]  ;;  %v338_v16 = vmax.f32 %v274_v7, 1e-06 }
  0x59   : > { %v323_v5 = vmax.f32 %v259_v2, 1e-06  ;;  %v291_v6 = vld [vmem:[%s1386_s25 + $0x178] sm:$0xff]  ;;  %v403_v9 = vmul.f32 %v339_v3, %v339_v3  ;;  %v290_v14 = vld [vmem:[%s1386_s25 + $0x170] sm:$0xff]  ;;  %v370_v17 = vmax.f32 %v306_v8, 1e-06 }
  0x5a   : > { %v435_v10 = vmul.f32 %v371_v4, %v371_v4  ;;  %v355_v12 = vmax.f32 %v291_v6, 1e-06  ;;  %v322_v18 = vmax.f32 %v258_v13, 1e-06  ;;  %v305_v23 = vld [vmem:[%s1386_s25 + $0x1e8] sm:$0xff]  ;;  %v402_v26 = vmul.f32 %v338_v16, %v338_v16  ;;  %v272_v30 = vld [vmem:[%s1386_s25 + $0xe0] sm:$0xff] }
  0x5b   : > { %v387_v11 = vmul.f32 %v323_v5, %v323_v5  ;;  %v467_v19 = vmul.f32 %v403_v9, %v339_v3  ;;  %v257_v24 = vld [vmem:[%s1386_s25 + $0x68] sm:$0xff]  ;;  %v434_v27 = vmul.f32 %v370_v17, %v370_v17  ;;  %v354_v29 = vmax.f32 %v290_v14, 1e-06  ;;  %v304_v31 = vld [vmem:[%s1386_s25 + $0x1e0] sm:$0xff]  ;;  %v271_v46 = vld [vmem:[%s1386_s25 + $0xd8] sm:$0xff]  ;;  %s242_s22 = scalar_lea.vmem [#allocation8], %s858_s26 }
  0x5c   : > { %v499_v20 = vmul.f32 %v435_v10, %v371_v4  ;;  %v419_v22 = vmul.f32 %v355_v12, %v355_v12  ;;  %v289_v25 = vld [vmem:[%s1386_s25 + $0x168] sm:$0xff]  ;;  %v386_v28 = vmul.f32 %v322_v18, %v322_v18  ;;  %v256_v32 = vld [vmem:[%s1386_s25 + $0x60] sm:$0xff]  ;;  %v337_v34 = vmax.f32 %v273_v15, 1e-06  ;;  %v303_v47 = vld [vmem:[%s1386_s25 + $0x1d8] sm:$0xff]  ;;  %s757_s11 = sshll.u32 %s242_s22, 4  ;;  %s758_s11 = int_to_ptr.vmem [resolvable:$true] %s757_s11 }
  0x5d   : > { %v451_v21 = vmul.f32 %v387_v11, %v323_v5  ;;  %865 = vmatprep.subr.mxu0 %v467_v19  ;;  %v369_v35 = vmax.f32 %v305_v23, 1e-06  ;;  %v321_v36 = vmax.f32 %v257_v24, 1e-06  ;;  %v466_v37 = vmul.f32 %v402_v26, %v338_v16  ;;  %v288_v41 = vld [vmem:[%s1386_s25 + $0x160] sm:$0xff]  ;;  %v255_v48 = vld [vmem:[%s1386_s25 + $0x58] sm:$0xff] }
  0x5e   : > { %900 = vmatprep.subr.mxu1 %v499_v20  ;;  %v483_v33 = vmul.f32 %v419_v22, %v355_v12  ;;  %v498_v38 = vmul.f32 %v434_v27, %v370_v17  ;;  %v450_v39 = vmul.f32 %v386_v28, %v322_v18  ;;  %v418_v40 = vmul.f32 %v354_v29, %v354_v29  ;;  %v287_v57 = vld [vmem:[%s1386_s25 + $0x158] sm:$0xff]  ;;  %v270_v62 = vld [vmem:[%s1386_s25 + $0xd0] sm:$0xff]  ;;  %v269_v14 = vld [vmem:[%s1386_s25 + $0xc8] sm:$0xff]  ;;  %s744_s8 = scalar_lea.sflag [#allocation4], %s1382_s1  ;;  %s1142_s13 = scalar_lea.vmem %s758_s11, 128 }
  0x5f   : > { %866 = vmatpush3.msra.mxu0 %v451_v21  ;;  %v401_v42 = vmul.f32 %v337_v34, %v337_v34  ;;  %v433_v43 = vmul.f32 %v369_v35, %v369_v35  ;;  %v385_v44 = vmul.f32 %v321_v36, %v321_v36  ;;  %v353_v45 = vmax.f32 %v289_v25, 1e-06  ;;  %v302_v63 = vld [vmem:[%s1386_s25 + $0x1d0] sm:$0xff]  ;;  %v301_v15 = vld [vmem:[%s1386_s25 + $0x1c8] sm:$0xff]  ;;  %p1143_p2 = scmp.ne.s32.totalorder %s758_s11, %s1142_s13  ;;  %p1528_p0 = scmp.ne.s32.totalorder %s1517_s27, 0 }
  0x60   : > { %901 = vmatpush3.msra.mxu1 %v483_v33  ;;  %867 = vmatprep.subr.mxu0 %v466_v37  ;;  %v482_v49 = vmul.f32 %v418_v40, %v354_v29  ;;  %v336_v50 = vmax.f32 %v272_v30, 1e-06  ;;  %v368_v51 = vmax.f32 %v304_v31, 1e-06  ;;  %v320_v52 = vmax.f32 %v256_v32, 1e-06 }
  0x61   : > { %902 = vmatprep.subr.mxu1 %v498_v38  ;;  %868 = vmatpush3.msra.mxu0 %v450_v39  ;;  %v465_v53 = vmul.f32 %v401_v42, %v337_v34  ;;  %v497_v54 = vmul.f32 %v433_v43, %v369_v35  ;;  %v449_v55 = vmul.f32 %v385_v44, %v321_v36  ;;  %v352_v61 = vmax.f32 %v288_v41, 1e-06  ;;  %v254_v0 = vld [vmem:[%s1386_s25 + $0x50] sm:$0xff]  ;;  %v253_v16 = vld [vmem:[%s1386_s25 + $0x48] sm:$0xff]  ;;  %v268_v30 = vld [vmem:[%s1386_s25 + $0xc0] sm:$0xff]  ;;  %p1144_p4 = pnand %p1143_p2, %p1528_p0  ;;  %s1219_s30 = smov [#allocation8]  }
  0x62   : > { %v417_v56 = vmul.f32 %v353_v45, %v353_v45  ;;  %903 = vmatpush3.msra.mxu1 %v482_v49  ;;  %v400_v58 = vmul.f32 %v336_v50, %v336_v50  ;;  %v432_v59 = vmul.f32 %v368_v51, %v368_v51  ;;  %v384_v60 = vmul.f32 %v320_v52, %v320_v52  ;;  %v286_v9 = vld [vmem:[%s1386_s25 + $0x150] sm:$0xff]  ;;  %v285_v25 = vld [vmem:[%s1386_s25 + $0x148] sm:$0xff]  ;;  %v300_v31 = vld [vmem:[%s1386_s25 + $0x1c0] sm:$0xff]  ;;  %s1146_s19 = sshll.u32 %s1219_s30, 4  ;;  %s1147_s19 = int_to_ptr.vmem [resolvable:$false] %s1146_s19 }
  0x63   : > { %869 = vmatprep.subr.mxu0 %v465_v53  ;;  %904 = vmatprep.subr.mxu1 %v497_v54  ;;  %v335_v2 = vmax.f32 %v271_v46, 1e-06  ;;  %v367_v3 = vmax.f32 %v303_v47, 1e-06  ;;  %v319_v4 = vmax.f32 %v255_v48, 1e-06  ;;  %v416_v8 = vmul.f32 %v352_v61, %v352_v61  ;;  %p1145_p5 = pneg %p1144_p4  ;;  %p1149_p9 = scmp.lt.s32.totalorder %s758_s11, %s1147_s19 }
  0x64   : > { %v481_v1 = vmul.f32 %v417_v56, %v353_v45  ;;  %870 = vmatpush3.msra.mxu0 %v449_v55  ;;  %v464_v5 = vmul.f32 %v400_v58, %v336_v50  ;;  %v496_v6 = vmul.f32 %v432_v59, %v368_v51  ;;  %v448_v7 = vmul.f32 %v384_v60, %v320_v52  ;;  %v252_v32 = vld [vmem:[%s1386_s25 + $0x40] sm:$0xff]  ;;  %v267_v46 = vld [vmem:[%s1386_s25 + $0xb8] sm:$0xff]  ;;  %s1148_s10 = scalar_lea.vmem %s1147_s19, 256 }
  0x65   : > { %v399_v10 = vmul.f32 %v335_v2, %v335_v2  ;;  %v431_v11 = vmul.f32 %v367_v3, %v367_v3  ;;  %v383_v12 = vmul.f32 %v319_v4, %v319_v4  ;;  %v351_v13 = vmax.f32 %v287_v57, 1e-06  ;;  %v284_v41 = vld [vmem:[%s1386_s25 + $0x140] sm:$0xff]  ;;  %v299_v47 = vld [vmem:[%s1386_s25 + $0x1b8] sm:$0xff]  ;;  %p1150_p10 = scmp.lt.s32.totalorder %s1148_s10, %s1142_s13 }
  0x66   : > { %905 = vmatpush3.msra.mxu1 %v481_v1  ;;  %871 = vmatprep.subr.mxu0 %v464_v5  ;;  %v480_v17 = vmul.f32 %v416_v8, %v352_v61  ;;  %v334_v18 = vmax.f32 %v270_v62, 1e-06  ;;  %v366_v19 = vmax.f32 %v302_v63, 1e-06  ;;  %v318_v20 = vmax.f32 %v254_v0, 1e-06 }
  0x67   : > { %906 = vmatprep.subr.mxu1 %v496_v6  ;;  %872 = vmatpush3.msra.mxu0 %v448_v7  ;;  %v463_v21 = vmul.f32 %v399_v10, %v335_v2  ;;  %v495_v22 = vmul.f32 %v431_v11, %v367_v3  ;;  %v447_v23 = vmul.f32 %v383_v12, %v319_v4  ;;  %v350_v29 = vmax.f32 %v286_v9, 1e-06  ;;  %v251_v48 = vld [vmem:[%s1386_s25 + $0x38] sm:$0xff]  ;;  %v266_v62 = vld [vmem:[%s1386_s25 + $0xb0] sm:$0xff]  ;;  %p1151_p1 = por %p1150_p10, %p1149_p9 }
  0x68   : > { %v415_v24 = vmul.f32 %v351_v13, %v351_v13  ;;  %907 = vmatpush3.msra.mxu1 %v480_v17  ;;  %v398_v26 = vmul.f32 %v334_v18, %v334_v18  ;;  %v430_v27 = vmul.f32 %v366_v19, %v366_v19  ;;  %v382_v28 = vmul.f32 %v318_v20, %v318_v20  ;;  %v283_v57 = vld [vmem:[%s1386_s25 + $0x138] sm:$0xff]  ;;  %v298_v63 = vld [vmem:[%s1386_s25 + $0x1b0] sm:$0xff] }
  0x69   : > { %873 = vmatprep.subr.mxu0 %v463_v21  ;;  %908 = vmatprep.subr.mxu1 %v495_v22  ;;  %v333_v34 = vmax.f32 %v269_v14, 1e-06  ;;  %v365_v35 = vmax.f32 %v301_v15, 1e-06  ;;  %v317_v36 = vmax.f32 %v253_v16, 1e-06  ;;  %v414_v40 = vmul.f32 %v350_v29, %v350_v29  ;;  %p1152_p12 = pnand %p1151_p1, %p1145_p5 }
  0x6a   : > { %v479_v33 = vmul.f32 %v415_v24, %v351_v13  ;;  %874 = vmatpush3.msra.mxu0 %v447_v23  ;;  %v462_v37 = vmul.f32 %v398_v26, %v334_v18  ;;  %v494_v38 = vmul.f32 %v430_v27, %v366_v19  ;;  %v446_v39 = vmul.f32 %v382_v28, %v318_v20  ;;  %v250_v0 = vld [vmem:[%s1386_s25 + $0x30] sm:$0xff]  ;;  %v265_v14 = vld [vmem:[%s1386_s25 + $0xa8] sm:$0xff] }
  0x6b   : > { %v397_v42 = vmul.f32 %v333_v34, %v333_v34  ;;  %v429_v43 = vmul.f32 %v365_v35, %v365_v35  ;;  %v381_v44 = vmul.f32 %v317_v36, %v317_v36  ;;  %v349_v45 = vmax.f32 %v285_v25, 1e-06  ;;  %v282_v9 = vld [vmem:[%s1386_s25 + $0x130] sm:$0xff]  ;;  %v297_v15 = vld [vmem:[%s1386_s25 + $0x1a8] sm:$0xff] }
  0x6c   : > { %909 = vmatpush3.msra.mxu1 %v479_v33  ;;  %875 = vmatprep.subr.mxu0 %v462_v37  ;;  %v478_v49 = vmul.f32 %v414_v40, %v350_v29  ;;  %v332_v50 = vmax.f32 %v268_v30, 1e-06  ;;  %v364_v51 = vmax.f32 %v300_v31, 1e-06  ;;  %v316_v52 = vmax.f32 %v252_v32, 1e-06 }
  0x6d   : > { %910 = vmatprep.subr.mxu1 %v494_v38  ;;  %876 = vmatpush3.msra.mxu0 %v446_v39  ;;  %v461_v53 = vmul.f32 %v397_v42, %v333_v34  ;;  %v493_v54 = vmul.f32 %v429_v43, %v365_v35  ;;  %v445_v55 = vmul.f32 %v381_v44, %v317_v36  ;;  %v348_v61 = vmax.f32 %v284_v41, 1e-06  ;;  %v249_v16 = vld [vmem:[%s1386_s25 + $0x28] sm:$0xff]  ;;  %v264_v30 = vld [vmem:[%s1386_s25 + $0xa0] sm:$0xff]  ;;  %v263_v42 = vld [vmem:[%s1386_s25 + $0x98] sm:$0xff] }
  0x6e   : > { %v413_v56 = vmul.f32 %v349_v45, %v349_v45  ;;  %911 = vmatpush3.msra.mxu1 %v478_v49  ;;  %v396_v58 = vmul.f32 %v332_v50, %v332_v50  ;;  %v428_v59 = vmul.f32 %v364_v51, %v364_v51  ;;  %v380_v60 = vmul.f32 %v316_v52, %v316_v52  ;;  %v281_v25 = vld [vmem:[%s1386_s25 + $0x128] sm:$0xff]  ;;  %v296_v31 = vld [vmem:[%s1386_s25 + $0x1a0] sm:$0xff]  ;;  %v247_v49 = vld [vmem:[%s1386_s25 + $0x18] sm:$0xff] }
  0x6f   : > { %877 = vmatprep.subr.mxu0 %v461_v53  ;;  %912 = vmatprep.subr.mxu1 %v493_v54  ;;  %v331_v2 = vmax.f32 %v267_v46, 1e-06  ;;  %v363_v3 = vmax.f32 %v299_v47, 1e-06  ;;  %v315_v4 = vmax.f32 %v251_v48, 1e-06  ;;  %v412_v8 = vmul.f32 %v348_v61, %v348_v61 }
  0x70   : > { %v477_v1 = vmul.f32 %v413_v56, %v349_v45  ;;  %878 = vmatpush3.msra.mxu0 %v445_v55  ;;  %v460_v5 = vmul.f32 %v396_v58, %v332_v50  ;;  %v492_v6 = vmul.f32 %v428_v59, %v364_v51  ;;  %v444_v7 = vmul.f32 %v380_v60, %v316_v52  ;;  %v248_v32 = vld [vmem:[%s1386_s25 + $0x20] sm:$0xff]  ;;  %v501_v43 = vld [vmem:[#allocation5 + $0x8] sm:$0xff]  ;;  %v295_v48 = vld [vmem:[%s1386_s25 + $0x198] sm:$0xff] }
  0x71   : > { %v395_v10 = vmul.f32 %v331_v2, %v331_v2  ;;  %v427_v11 = vmul.f32 %v363_v3, %v363_v3  ;;  %v379_v12 = vmul.f32 %v315_v4, %v315_v4  ;;  %v347_v13 = vmax.f32 %v283_v57, 1e-06  ;;  %v280_v41 = vld [vmem:[%s1386_s25 + $0x120] sm:$0xff]  ;;  %568 = vmatprep.mubr.f32.mxu0 %v501_v43  ;;  %v503_v50 = vld [vmem:[#allocation5 + $0x18] sm:$0xff] }
  0x72   : > { %913 = vmatpush3.msra.mxu1 %v477_v1  ;;  %879 = vmatprep.subr.mxu0 %v460_v5  ;;  %v476_v17 = vmul.f32 %v412_v8, %v348_v61  ;;  %v330_v18 = vmax.f32 %v266_v62, 1e-06  ;;  %v362_v19 = vmax.f32 %v298_v63, 1e-06  ;;  %v314_v20 = vmax.f32 %v250_v0, 1e-06 }
  0x73   : > { %914 = vmatprep.subr.mxu1 %v492_v6  ;;  %880 = vmatpush3.msra.mxu0 %v444_v7  ;;  %v459_v21 = vmul.f32 %v395_v10, %v331_v2  ;;  %v491_v22 = vmul.f32 %v427_v11, %v363_v3  ;;  %v443_v23 = vmul.f32 %v379_v12, %v315_v4  ;;  %v346_v29 = vmax.f32 %v282_v9, 1e-06  ;;  %v279_v59 = vld [vmem:[%s1386_s25 + $0x118] sm:$0xff]  ;;  %v262_v0 = vld [vmem:[%s1386_s25 + $0x90] sm:$0xff] }
  0x74   : > { %v411_v24 = vmul.f32 %v347_v13, %v347_v13  ;;  %915 = vmatpush3.msra.mxu1 %v476_v17  ;;  %v394_v26 = vmul.f32 %v330_v18, %v330_v18  ;;  %v426_v27 = vmul.f32 %v362_v19, %v362_v19  ;;  %v378_v28 = vmul.f32 %v314_v20, %v314_v20  ;;  %v294_v1 = vld [vmem:[%s1386_s25 + $0x190] sm:$0xff]  ;;  %v293_v17 = vld [vmem:[%s1386_s25 + $0x188] sm:$0xff] }
  0x75   : > { %881 = vmatprep.subr.mxu0 %v459_v21  ;;  %916 = vmatprep.subr.mxu1 %v491_v22  ;;  %v329_v34 = vmax.f32 %v265_v14, 1e-06  ;;  %v361_v35 = vmax.f32 %v297_v15, 1e-06  ;;  %v313_v36 = vmax.f32 %v249_v16, 1e-06  ;;  %v410_v40 = vmul.f32 %v346_v29, %v346_v29 }
  0x76   : > { %v475_v33 = vmul.f32 %v411_v24, %v347_v13  ;;  %882 = vmatpush3.msra.mxu0 %v443_v23  ;;  %v458_v37 = vmul.f32 %v394_v26, %v330_v18  ;;  %v490_v38 = vmul.f32 %v426_v27, %v362_v19  ;;  %v442_v39 = vmul.f32 %v378_v28, %v314_v20  ;;  %v246_v2 = vld [vmem:[%s1386_s25 + $0x10] sm:$0xff]  ;;  %v261_v16 = vld [vmem:[%s1386_s25 + $0x88] sm:$0xff] }
  0x77   : > { %v393_v44 = vmul.f32 %v329_v34, %v329_v34  ;;  %v425_v45 = vmul.f32 %v361_v35, %v361_v35  ;;  %v377_v46 = vmul.f32 %v313_v36, %v313_v36  ;;  %v345_v47 = vmax.f32 %v281_v25, 1e-06  ;;  %638 = vmatprep.mubr.f32.mxu1 %v503_v50  ;;  %v278_v11 = vld [vmem:[%s1386_s25 + $0x110] sm:$0xff]  ;;  %v245_v18 = vld [vmem:[%s1386_s25 + $0x8] sm:$0xff] }
  0x78   : > { %917 = vmatpush3.msra.mxu1 %v475_v33  ;;  %883 = vmatprep.subr.mxu0 %v458_v37  ;;  %v474_v51 = vmul.f32 %v410_v40, %v346_v29  ;;  %v328_v52 = vmax.f32 %v264_v30, 1e-06  ;;  %v360_v53 = vmax.f32 %v296_v31, 1e-06  ;;  %v312_v54 = vmax.f32 %v248_v32, 1e-06 }
  0x79   : > { %918 = vmatprep.subr.mxu1 %v490_v38  ;;  %884 = vmatpush3.msra.mxu0 %v442_v39  ;;  %v457_v55 = vmul.f32 %v393_v44, %v329_v34  ;;  %v489_v56 = vmul.f32 %v425_v45, %v361_v35  ;;  %v441_v57 = vmul.f32 %v377_v46, %v313_v36  ;;  %v344_v63 = vmax.f32 %v280_v41, 1e-06  ;;  %v277_v27 = vld [vmem:[%s1386_s25 + $0x108] sm:$0xff]  ;;  %v260_v32 = vld [vmem:[%s1386_s25 + $0x80] sm:$0xff] }
  0x7a   : > { %v409_v58 = vmul.f32 %v345_v47, %v345_v47  ;;  %919 = vmatpush3.msra.mxu1 %v474_v51  ;;  %v392_v60 = vmul.f32 %v328_v52, %v328_v52  ;;  %v424_v61 = vmul.f32 %v360_v53, %v360_v53  ;;  %v376_v62 = vmul.f32 %v312_v54, %v312_v54  ;;  %v292_v33 = vld [vmem:[%s1386_s25 + $0x180] sm:$0xff] }
  0x7b   : > { %885 = vmatprep.subr.mxu0 %v457_v55  ;;  %920 = vmatprep.subr.mxu1 %v489_v56  ;;  %v327_v4 = vmax.f32 %v263_v42, 1e-06  ;;  %v359_v5 = vmax.f32 %v295_v48, 1e-06  ;;  %v311_v6 = vmax.f32 %v247_v49, 1e-06  ;;  %v408_v10 = vmul.f32 %v344_v63, %v344_v63 }
  0x7c   : > { %v473_v3 = vmul.f32 %v409_v58, %v345_v47  ;;  %886 = vmatpush3.msra.mxu0 %v441_v57  ;;  %v456_v7 = vmul.f32 %v392_v60, %v328_v52  ;;  %v488_v8 = vmul.f32 %v424_v61, %v360_v53  ;;  %v440_v9 = vmul.f32 %v376_v62, %v312_v54  ;;  %v244_v34 = vld [vmem:[%s1386_s25] sm:$0xff] }
  0x7d   : > { %v391_v12 = vmul.f32 %v327_v4, %v327_v4  ;;  %v423_v13 = vmul.f32 %v359_v5, %v359_v5  ;;  %v375_v14 = vmul.f32 %v311_v6, %v311_v6  ;;  %v343_v15 = vmax.f32 %v279_v59, 1e-06  ;;  %v276_v47 = vld [vmem:[%s1386_s25 + $0x100] sm:$0xff] }
  0x7e   : > { %921 = vmatpush3.msra.mxu1 %v473_v3  ;;  %887 = vmatprep.subr.mxu0 %v456_v7  ;;  %v472_v19 = vmul.f32 %v408_v10, %v344_v63  ;;  %v326_v20 = vmax.f32 %v262_v0, 1e-06  ;;  %v358_v21 = vmax.f32 %v294_v1, 1e-06  ;;  %v310_v22 = vmax.f32 %v246_v2, 1e-06 }
  0x7f   : > { %922 = vmatprep.subr.mxu1 %v488_v8  ;;  %888 = vmatpush3.msra.mxu0 %v440_v9  ;;  %v455_v23 = vmul.f32 %v391_v12, %v327_v4  ;;  %v487_v24 = vmul.f32 %v423_v13, %v359_v5  ;;  %v439_v25 = vmul.f32 %v375_v14, %v311_v6  ;;  %v342_v31 = vmax.f32 %v278_v11, 1e-06  ;;  %v500_v1 = vld [vmem:[#allocation5] sm:$0xff]  ;;  %v502_v3 = vld [vmem:[#allocation5 + $0x10] sm:$0xff]  ;;  %v664_v5 = vld [vmem:[#allocation7 + $0x78] sm:$0xff] }
  0x80   : > { %v407_v26 = vmul.f32 %v343_v15, %v343_v15  ;;  %923 = vmatpush3.msra.mxu1 %v472_v19  ;;  %v390_v28 = vmul.f32 %v326_v20, %v326_v20  ;;  %v422_v29 = vmul.f32 %v358_v21, %v358_v21  ;;  %v374_v30 = vmul.f32 %v310_v22, %v310_v22  ;;  %v663_v6 = vld [vmem:[#allocation7 + $0x70] sm:$0xff]  ;;  %v662_v7 = vld [vmem:[#allocation7 + $0x68] sm:$0xff]  ;;  %v661_v8 = vld [vmem:[#allocation7 + $0x60] sm:$0xff] }
  0x81   : > { %889 = vmatprep.subr.mxu0 %v455_v23  ;;  %924 = vmatprep.subr.mxu1 %v487_v24  ;;  %v325_v36 = vmax.f32 %v261_v16, 1e-06  ;;  %v357_v37 = vmax.f32 %v293_v17, 1e-06  ;;  %v309_v38 = vmax.f32 %v245_v18, 1e-06  ;;  %v406_v42 = vmul.f32 %v342_v31, %v342_v31 }
  0x82   : > { %v471_v35 = vmul.f32 %v407_v26, %v343_v15  ;;  %890 = vmatpush3.msra.mxu0 %v439_v25  ;;  %v454_v39 = vmul.f32 %v390_v28, %v326_v20  ;;  %v486_v40 = vmul.f32 %v422_v29, %v358_v21  ;;  %v438_v41 = vmul.f32 %v374_v30, %v310_v22  ;;  %v660_v9 = vld [vmem:[#allocation7 + $0x58] sm:$0xff]  ;;  %v659_v10 = vld [vmem:[#allocation7 + $0x50] sm:$0xff]  ;;  %v658_v11 = vld [vmem:[#allocation7 + $0x48] sm:$0xff] }
  0x83   : > { %v389_v43 = vmul.f32 %v325_v36, %v325_v36  ;;  %v421_v44 = vmul.f32 %v357_v37, %v357_v37  ;;  %v373_v45 = vmul.f32 %v309_v38, %v309_v38  ;;  %v341_v46 = vmax.f32 %v277_v27, 1e-06  ;;  %v657_v12 = vld [vmem:[#allocation7 + $0x40] sm:$0xff]  ;;  %v656_v13 = vld [vmem:[#allocation7 + $0x38] sm:$0xff]  ;;  %v655_v14 = vld [vmem:[#allocation7 + $0x30] sm:$0xff] }
  0x84   : > { %925 = vmatpush3.msra.mxu1 %v471_v35  ;;  %891 = vmatprep.subr.mxu0 %v454_v39  ;;  %v470_v48 = vmul.f32 %v406_v42, %v342_v31  ;;  %v324_v49 = vmax.f32 %v260_v32, 1e-06  ;;  %v356_v50 = vmax.f32 %v292_v33, 1e-06  ;;  %v308_v51 = vmax.f32 %v244_v34, 1e-06 }
  0x85   : > { %926 = vmatprep.subr.mxu1 %v486_v40  ;;  %892 = vmatpush3.msra.mxu0 %v438_v41  ;;  %v453_v52 = vmul.f32 %v389_v43, %v325_v36  ;;  %v485_v53 = vmul.f32 %v421_v44, %v357_v37  ;;  %v437_v54 = vmul.f32 %v373_v45, %v309_v38  ;;  %v340_v59 = vmax.f32 %v276_v47, 1e-06  ;;  %v654_v15 = vld [vmem:[#allocation7 + $0x28] sm:$0xff]  ;;  %v653_v16 = vld [vmem:[#allocation7 + $0x20] sm:$0xff]  ;;  %v652_v17 = vld [vmem:[#allocation7 + $0x18] sm:$0xff] }
  0x86   : > { %v405_v55 = vmul.f32 %v341_v46, %v341_v46  ;;  %927 = vmatpush3.msra.mxu1 %v470_v48  ;;  %v388_v56 = vmul.f32 %v324_v49, %v324_v49  ;;  %v420_v57 = vmul.f32 %v356_v50, %v356_v50  ;;  %v372_v58 = vmul.f32 %v308_v51, %v308_v51  ;;  %v651_v18 = vld [vmem:[#allocation7 + $0x10] sm:$0xff]  ;;  %v650_v19 = vld [vmem:[#allocation7 + $0x8] sm:$0xff]  ;;  %v649_v20 = vld [vmem:[#allocation7] sm:$0xff] }
  0x87   : > { %893 = vmatprep.subr.mxu0 %v453_v52  ;;  %928 = vmatprep.subr.mxu1 %v485_v53  ;;  %v404_v0 = vmul.f32 %v340_v59, %v340_v59  ;;  %v1217_v4 = vmov 0.0   ;;  %v859_v33 = vld [vmem:[%s1508_s3] ss:$0 sm:$0xff] }
  0x88   : > { %v469_v60 = vmul.f32 %v405_v55, %v341_v46  ;;  %894 = vmatpush3.msra.mxu0 %v437_v54  ;;  %v452_v61 = vmul.f32 %v388_v56, %v324_v49  ;;  %v484_v62 = vmul.f32 %v420_v57, %v356_v50  ;;  %v436_v63 = vmul.f32 %v372_v58, %v308_v51 }
  0x89   : > { %v468_v2 = vmul.f32 %v404_v0, %v340_v59 }
  0x8a   : > { %929 = vmatpush3.msra.mxu1 %v469_v60  ;;  %895 = vmatprep.subr.mxu0 %v452_v61 }
  0x8b   : > { %930 = vmatprep.subr.mxu1 %v484_v62  ;;  %896 = vmatpush3.msra.mxu0 %v436_v63 }
  0x8c   : > { %931 = vmatpush3.msra.mxu1 %v468_v2  ;;  %569 = vmatmul.mubr.f32.vlgmr.msra.gmra.mxu0 %v500_v1 }
  0x8d   : > { %639 = vmatmul.mubr.f32.vlgmr.msra.gmra.mxu1 %v502_v3  ;;  %952 = vmatprep.subr.mxu0 %v1217_v4 }
  0x8e   : > { %953 = vmatpush3.msra.mxu0 %v664_v5  ;;  %984 = vmatprep.mubr.msk.f32.mxu0 %vm1218_vm0, %v1217_v4 }
  0x8f   : > { %954 = vmatprep.subr.mxu0 %v1217_v4 }
  0x90   : > { %955 = vmatpush3.msra.mxu0 %v663_v6 }
  0x91   : > { %956 = vmatprep.subr.mxu0 %v1217_v4 }
  0x92   : > { %957 = vmatpush3.msra.mxu0 %v662_v7 }
  0x93   : > { %958 = vmatprep.subr.mxu0 %v1217_v4 }
  0x94   : > { %959 = vmatpush3.msra.mxu0 %v661_v8 }
  0x95   : > { %960 = vmatprep.subr.mxu0 %v1217_v4 }
  0x96   : > { %961 = vmatpush3.msra.mxu0 %v660_v9 }
  0x97   : > { %962 = vmatprep.subr.mxu0 %v1217_v4 }
  0x98   : > { %963 = vmatpush3.msra.mxu0 %v659_v10 }
  0x99   : > { %964 = vmatprep.subr.mxu0 %v1217_v4 }
  0x9a   : > { %965 = vmatpush3.msra.mxu0 %v658_v11 }
  0x9b   : > { %966 = vmatprep.subr.mxu0 %v1217_v4 }
  0x9c   : > { %967 = vmatpush3.msra.mxu0 %v657_v12 }
  0x9d   : > { %968 = vmatprep.subr.mxu0 %v1217_v4 }
  0x9e   : > { %969 = vmatpush3.msra.mxu0 %v656_v13 }
  0x9f   : > { %970 = vmatprep.subr.mxu0 %v1217_v4 }
  0xa0   : > { %971 = vmatpush3.msra.mxu0 %v655_v14 }
  0xa1   : > { %972 = vmatprep.subr.mxu0 %v1217_v4 }
  0xa2   : > { %973 = vmatpush3.msra.mxu0 %v654_v15 }
  0xa3   : > { %974 = vmatprep.subr.mxu0 %v1217_v4 }
  0xa4   : > { %975 = vmatpush3.msra.mxu0 %v653_v16 }
  0xa5   : > { %976 = vmatprep.subr.mxu0 %v1217_v4 }
  0xa6   : > { %977 = vmatpush3.msra.mxu0 %v652_v17 }
  0xa7   : > { %978 = vmatprep.subr.mxu0 %v1217_v4 }
  0xa8   : > { %979 = vmatpush3.msra.mxu0 %v651_v18 }
  0xa9   : > { %980 = vmatprep.subr.mxu0 %v1217_v4 }
  0xaa   : > { %981 = vmatpush3.msra.mxu0 %v650_v19 }
  0xab   : > { %982 = vmatprep.subr.mxu0 %v1217_v4 }
  0xac   : > { %983 = vmatpush3.msra.mxu0 %v649_v20 }
 0x14c   : > { %v897_v21 = vpop.f32.mrf.mxu0 }
 0x14d   : > { %v932_v22 = vpop.f32.mrf.mxu1 }
 0x14e   : > { %v898_v23 = vpop.f32.mrf.mxu0 }
 0x14f   : > { %v899_v24 = vadd.f32 %v898_v23, %v897_v21  ;;  %v933_v25 = vpop.f32.mrf.mxu1 }
 0x150   : > { %v934_v26 = vadd.f32 %v933_v25, %v932_v22 }
 0x152   : > { %v641_v27 = vadd.f32 %v934_v26, %v899_v24 }
 0x154   : > { %1058 = vlog2.f32 %v641_v27 }
 0x161   : > { %v1059_v28 = vpop.eup %1058 }
 0x162   : > { %v645_v29 = vmul.f32 0.6931472, %v1059_v28 }
 0x164   : > { %v646_v30 = vmul.f32 0.33333334, %v645_v29 }
 0x166   : > { %v647_v31 = vmul.f32 1.442695, %v646_v30 }
 0x168   : > { %1060 = vpow2.f32 %v647_v31 }
 0x175   : > { %v1061_v32 = vpop.eup %1060 }
 0x176   : > { %985 = vmatmul.mubr.f32.vlgmr.msra.gmra.mxu0 %v1061_v32 }
 0x236   : > { %v738_v34 = vpop.f32.mrf.mxu0 }
 0x237   : > { %v739_v35 = vadd.f32 %v859_v33, %v738_v34 }
 0x238   : > { %v986_v36 = vpop.f32.mrf.mxu0 }
 0x239   : > { %742 = vst [vmem:[%s242_s22] sm:$0xff] %v739_v35 }
 0x23a   : > { %1155 = shalt.err (!%p1152_p12)
}
 0x23b   : > { %s1156_s12 = scalar_lea.hbm %s1468_s5, 128  ;;  %s1160_s23 = scalar_lea.hbm %s1509_s4, 256 }
 0x23c   : > { %p1157_p6 = scmp.ne.s32.totalorder %s1468_s5, %s1156_s12  ;;  %p1161_p13 = scmp.lt.s32.totalorder %s1468_s5, %s1509_s4 }
 0x23d   : > { %p1162_p3 = scmp.lt.s32.totalorder %s1160_s23, %s1156_s12 }
 0x23e   : > { %p1158_p7 = pnand %p1157_p6, %p1528_p0 }
 0x23f   : > { %p1163_p8 = por %p1162_p3, %p1161_p13 }
 0x240   : > { %p1159_p11 = pneg %p1158_p7 }
 0x242   : > { %p1164_p2 = pnand %p1163_p8, %p1159_p11 }
 0x244   : > { %1167 = shalt.err (!%p1164_p2)
}
 0x245   : > { %997 = dma.vmem_to_hbm [thread:$0]  (%p1528_p0), %s758_s11, 128, %s1468_s5, %s744_s8  }
 0x246 PF: > { %s769_s29 = sand.u32 1, %s1198_s15   ;;  %p1529_p4 = scmp.ne.s32.totalorder %s1518_s28, 0 }
 0x247   : > { %p1530_p5 = scmp.ge.s32.totalorder %s1210_s18, 2  ;;  %s770_s7 = scalar_lea.sflag [#allocation4], %s769_s29 }
 0x249   : > { %p1011_p9 = pnand %p1530_p5, %p1529_p4 }
 0x24b   : > { %p1012_p10 = pneg %p1011_p9 }
 0x24d   : > { %1193 = dma.done.wait (%p1012_p10), %s770_s7, 128  }
 0x24e   : > { %1195 = vsyncadd (%p1012_p10), %s770_s7, 4294967168  ;;  %p18_p1 = scmp.ge.s32.totalorder %s1270_s21, 4   ;;  %s1531_s15 = smov %s1202_s16 }
 0x24f   : > { %s1532_s16 = smov %s1206_s17  ;;  %s1533_s17 = smov %s1282_s24 }
 0x250   : > { %s1534_s18 = smov %s1270_s21  ;;  %20 = sbr.rel (!%p18_p1) target bundleno = 8 (0x8), region = 89 }
 0x255   :  { %775 = vsyncpa [#allocation3], 1 }
 0x256   :  { %777 = vsyncpa [#allocation3 + $0x1], 1 }
 0x257   :  { %778 = vsyncpa [#allocation6], 1 }
 0x258   :  { %779 = vsyncpa [#allocation4], 1 }
 0x259   :  { %781 = vsyncpa [#allocation4 + $0x1], 1 }

</bundles_post_ra>
